<compile_context>
chip_gen: v7x
topology: tpu7x:2x2x1
jax: 0.10.0
libtpu: 0.0.40
codegen_flags: <defaults>
</compile_context>

<pallas_src>
from functools import partial

import jax
import jax.numpy as jnp
from jax.experimental import pallas as pl
from jax.experimental.pallas import tpu as pltpu


# --------------------------------------------------------------------------
# Tiling plan
# --------------------------------------------------------------------------

def _round_up(v, m):
    return ((v + m - 1) // m) * m


_WEIGHT_BLOCK_BYTES = 8 * 1024 * 1024  # per-step streamed weight block budget


def _plan_kn(K, N, compute_dtype):
    """Tile sizes along K (contraction) and N (classes) plus padded extents.

    tn is capped (<= 2048 lanes) and tk sized so a single streamed weight
    block stays under ~8 MiB -> double/triple buffering fits comfortably in
    v7x's 64 MiB VMEM as well as v5e/v6e's 128 MiB.
    """
    itemsize = jnp.dtype(compute_dtype).itemsize
    tn = min(2048, _round_up(N, 128))
    Np = _round_up(N, tn)
    max_tk = max(128, (_WEIGHT_BLOCK_BYTES // (tn * itemsize)) // 128 * 128)
    tk = min(max_tk, _round_up(K, 128))
    Kp = _round_up(K, tk)
    return tk, tn, Kp, Np


# --------------------------------------------------------------------------
# One-time parameter preparation (hoisted out of the forward pass)
# --------------------------------------------------------------------------

def prepare_linear_params(w_torch, b, *, compute_dtype=jnp.bfloat16):
    """Transpose the PyTorch-layout weight to (K, N), pad to tile multiples
    and cast to the MXU compute dtype.  Done once, reused every forward."""
    N, K = w_torch.shape
    tk, tn, Kp, Np = _plan_kn(K, N, compute_dtype)

    wT = jnp.transpose(w_torch)                          # (K, N) matmul layout
    if (Kp, Np) != (K, N):
        wT = jnp.pad(wT, ((0, Kp - K), (0, Np - N)))
    w_p = wT.astype(compute_dtype)

    b_p = b.astype(jnp.float32)
    if Np != N:
        b_p = jnp.pad(b_p, (0, Np - N))
    b_p = b_p.reshape(1, Np)

    return {"w": w_p, "b": b_p, "num_classes": N, "tk": tk, "tn": tn}


# --------------------------------------------------------------------------
# Pallas kernel: o[i,j] = sum_k x[i,k] @ w[k,j] + b[j]
#   grid = (M tiles, N tiles, K tiles); K last ("arbitrary"), M/N "parallel".
#   Output block index is constant over k -> it stays VMEM-resident and is
#   used directly as the f32 accumulator (no scratch).
# --------------------------------------------------------------------------

def _linear_bias_kernel(x_ref, w_ref, b_ref, o_ref):
    @pl.when(pl.program_id(2) == 0)
    def _init():
        o_ref[...] = jnp.broadcast_to(b_ref[...], o_ref.shape)

    # Activations arrive as f32 and are cast in-vreg to the compute dtype;
    # the VPU convert rides in slack and the f32 DMA is the only x traffic.
    x = x_ref[...].astype(w_ref.dtype)
    o_ref[...] += jnp.dot(x, w_ref[...], preferred_element_type=jnp.float32)


# --------------------------------------------------------------------------
# Jitted forward wrapper (pad-if-needed + pallas_call + slice, fused)
# --------------------------------------------------------------------------

@partial(jax.jit, static_argnums=(3, 4, 5))
def _linear_forward(x, w_p, b_p, num_classes, tk, tn):
    M, K = x.shape
    Kp, Np = w_p.shape

    # Small batches: keep tm = round_up(M, 8) so no M padding op is needed
    # (the kernel is overhead-bound at tiny M); large batches cap at 128.
    tm = min(128, _round_up(max(M, 1), 8))
    Mp = _round_up(M, tm)

    x_in = x.astype(jnp.float32)
    if (Mp, Kp) != (M, K):                       # elide no-op pads
        x_in = jnp.pad(x_in, ((0, Mp - M), (0, Kp - K)))

    grid = (Mp // tm, Np // tn, Kp // tk)
    nk = grid[2]

    if nk > 1:
        # Deeper pipelining on the streamed weight operand when K is tiled.
        w_spec = pl.BlockSpec((tk, tn), lambda i, j, k: (k, j),
                              pipeline_mode=pl.Buffered(3))
    else:
        w_spec = pl.BlockSpec((tk, tn), lambda i, j, k: (k, j))

    out = pl.pallas_call(
        _linear_bias_kernel,
        grid=grid,
        in_specs=[
            pl.BlockSpec((tm, tk), lambda i, j, k: (i, k)),   # activations f32
            w_spec,                                            # weights (pre-cast)
            pl.BlockSpec((1, tn), lambda i, j, k: (0, j)),     # bias f32
        ],
        out_specs=pl.BlockSpec((tm, tn), lambda i, j, k: (i, j)),
        out_shape=jax.ShapeDtypeStruct((Mp, Np), jnp.float32),
        compiler_params=pltpu.CompilerParams(
            dimension_semantics=("parallel", "parallel", "arbitrary")),
        cost_estimate=pl.CostEstimate(
            flops=2 * Mp * Kp * Np,
            transcendentals=0,
            bytes_accessed=(Mp * Kp * 4 + Kp * Np * w_p.dtype.itemsize
                            + Mp * Np * 4 + Np * 4)),
    )(x_in, w_p, b_p)

    return out[:M, :num_classes]


# --------------------------------------------------------------------------
# ResNetClassifier forward
# --------------------------------------------------------------------------

def resnet_classifier_forward(prepared, x):
    return _linear_forward(x, prepared["w"], prepared["b"],
                           prepared["num_classes"], prepared["tk"],
                           prepared["tn"])


# --------------------------------------------------------------------------
# Main
# --------------------------------------------------------------------------

if __name__ == "__main__":
    key = jax.random.PRNGKey(0)
    kx, kw, kb = jax.random.split(key, 3)

    # Shapes consistent with the module: ResNetClassifier(512, 10) applied to
    # a (batch, in_features) feature tensor.
    batch, in_features, num_classes = 8, 512, 10

    x = jax.random.normal(kx, (batch, in_features), dtype=jnp.float32)

    # nn.Linear default-style init (uniform in +-1/sqrt(fan_in)), PyTorch layout.
    bound = 1.0 / (in_features ** 0.5)
    fc_w = jax.random.uniform(kw, (num_classes, in_features),
                              jnp.float32, -bound, bound)
    fc_b = jax.random.uniform(kb, (num_classes,),
                              jnp.float32, -bound, bound)

    # One-time weight prep (transpose + pad + bf16 cast), reused every call.
    prepared = prepare_linear_params(fc_w, fc_b)

    y = resnet_classifier_forward(prepared, x)
    y = jax.block_until_ready(y)

    # Reference with the same bf16 operand cast (accumulation in f32).
    ref = jnp.dot(x.astype(jnp.bfloat16).astype(jnp.float32),
                  fc_w.astype(jnp.bfloat16).astype(jnp.float32).T)
    ref = ref + fc_b[None, :]

    assert y.shape == (batch, num_classes), y.shape
    assert bool(jnp.all(jnp.isfinite(y)))
    assert bool(jnp.allclose(y, ref, rtol=1e-3, atol=1e-3)), \
        float(jnp.max(jnp.abs(y - ref)))

    print("KERNEL_OK")
</pallas_src>

<mosaic_0001>
module attributes {stable_mosaic.version = 11 : i64} {
  func.func @_linear_bias_kernel(%arg0: i32, %arg1: i32, %arg2: i32, %arg3: memref<8x512xf32, #tpu.memory_space<vmem>>, %arg4: memref<512x128xbf16, #tpu.memory_space<vmem>>, %arg5: memref<1x128xf32, #tpu.memory_space<vmem>>, %arg6: memref<8x128xf32, #tpu.memory_space<vmem>>) attributes {dimension_semantics = [#tpu.dimension_semantics<parallel>, #tpu.dimension_semantics<parallel>, #tpu.dimension_semantics<arbitrary>], iteration_bounds = array<i64: 1, 1, 1>, scalar_prefetch = 0 : i64, scratch_operands = 0 : i64, tpu.core_type = #tpu.core_type<tc>, window_params = [{transform_indices = @transform_0, window_bounds = array<i64: 8, 512>}, {transform_indices = @transform_1, window_bounds = array<i64: 512, 128>}, {transform_indices = @transform_2, window_bounds = array<i64: 1, 128>}, {transform_indices = @transform_3, window_bounds = array<i64: 8, 128>}]} {
    %c0_i32 = arith.constant 0 : i32
    %0 = arith.cmpi eq, %arg2, %c0_i32 : i32
    %1 = arith.extui %0 : i1 to i32
    %c0_i32_0 = arith.constant 0 : i32
    %2 = arith.cmpi ne, %1, %c0_i32_0 : i32
    scf.if %2 {
      %c0_8 = arith.constant 0 : index
      %c0_9 = arith.constant 0 : index
      %10 = vector.load %arg5[%c0_8, %c0_9] : memref<1x128xf32, #tpu.memory_space<vmem>>, vector<1x128xf32>
      %11 = vector.shape_cast %10 : vector<1x128xf32> to vector<1x128xf32>
      %12 = vector.broadcast %11 : vector<1x128xf32> to vector<8x128xf32>
      %c0_10 = arith.constant 0 : index
      %c0_11 = arith.constant 0 : index
      %13 = vector.load %arg6[%c0_10, %c0_11] : memref<8x128xf32, #tpu.memory_space<vmem>>, vector<8x128xf32>
      tpu.vector_store %arg6[%c0_10, %c0_11], %12 {strides = array<i32>} : memref<8x128xf32, #tpu.memory_space<vmem>>, vector<8x128xf32>,
    } else {
    }
    %c0 = arith.constant 0 : index
    %c0_1 = arith.constant 0 : index
    %3 = vector.load %arg3[%c0, %c0_1] : memref<8x512xf32, #tpu.memory_space<vmem>>, vector<8x512xf32>
    %4 = arith.truncf %3 : vector<8x512xf32> to vector<8x512xbf16>
    %c0_2 = arith.constant 0 : index
    %c0_3 = arith.constant 0 : index
    %5 = vector.load %arg6[%c0_2, %c0_3] : memref<8x128xf32, #tpu.memory_space<vmem>>, vector<8x128xf32>
    %c0_4 = arith.constant 0 : index
    %c0_5 = arith.constant 0 : index
    %6 = vector.load %arg4[%c0_4, %c0_5] : memref<512x128xbf16, #tpu.memory_space<vmem>>, vector<512x128xbf16>
    %cst = arith.constant dense<0.000000e+00> : vector<8x128xf32>
    %7 = tpu.matmul %4, %6, %cst {dimension_numbers = #tpu.dot_dimension_numbers<[1], [0], [0], [1], [0, 0, 1, 1], [], []>} : vector<8x512xbf16>, vector<512x128xbf16>, vector<8x128xf32> -> vector<8x128xf32>
    %8 = arith.addf %5, %7 : vector<8x128xf32>
    %c0_6 = arith.constant 0 : index
    %c0_7 = arith.constant 0 : index
    %9 = vector.load %arg6[%c0_6, %c0_7] : memref<8x128xf32, #tpu.memory_space<vmem>>, vector<8x128xf32>
    tpu.vector_store %arg6[%c0_6, %c0_7], %8 {strides = array<i32>} : memref<8x128xf32, #tpu.memory_space<vmem>>, vector<8x128xf32>,
    return
  }
  func.func @transform_0(%arg0: i32, %arg1: i32, %arg2: i32) -> (i32, i32) {
    %c0_i32 = arith.constant 0 : i32
    return %arg0, %arg2 : i32, i32
  }
  func.func @transform_1(%arg0: i32, %arg1: i32, %arg2: i32) -> (i32, i32) {
    %c0_i32 = arith.constant 0 : i32
    return %arg2, %arg1 : i32, i32
  }
  func.func @transform_2(%arg0: i32, %arg1: i32, %arg2: i32) -> (i32, i32) {
    %c0_i32 = arith.constant 0 : i32
    %c0_i32_0 = arith.constant 0 : i32
    return %c0_i32, %arg1 : i32, i32
  }
  func.func @transform_3(%arg0: i32, %arg1: i32, %arg2: i32) -> (i32, i32) {
    %c0_i32 = arith.constant 0 : i32
    return %arg0, %arg1 : i32, i32
  }
}

</mosaic_0001>

<bundles_post_ra>
// kernel: _linear_forward.1
= control target key start
LH: loop header
LB: loop body
LE: loop exit
PB: predicated region body
PF: predicated region fallthrough
CT: control target
= control target key end

     0   :  { %8 = vsyncpa [#allocation3], 0  ;;  %s674_s0 = inlined_call_operand.hbm [shape: f32[8,512], index: 0, kind: input, shape index: {}]   ;;  %s675_s1 = inlined_call_operand.hbm [shape: bf16[512,128], index: 1, kind: input, shape index: {}]   ;;  %s676_s2 = inlined_call_operand.vmem [shape: f32[1,128], index: 2, kind: input, shape index: {}]   ;;  %s677_s3 = inlined_call_operand.hbm [shape: f32[8,128], index: 3, kind: output, shape index: {}]  }
   0x1   :  { %9 = vsyncpa [#allocation6], 0 }
   0x2   :  { %10 = vsyncpa [#allocation4], 0  ;;  %s603_s12 = smov [#allocation2]   ;;  %s604_s14 = smov [#allocation5]  }
   0x3   :  { %s17_s13 = sshll.u32 %s603_s12, 4  ;;  %s26_s15 = sshll.u32 %s604_s14, 4  ;;  %s18_s13 = int_to_ptr.vmem [resolvable:$true] %s17_s13  ;;  %s628_s15 = int_to_ptr.vmem [resolvable:$true] %s26_s15 }
   0x4   :  { %s531_s18 = scalar_lea.hbm %s674_s0, 512 }
   0x5   :  { %p532_p0 = scmp.ne.s32.totalorder %s674_s0, %s531_s18  ;;  %p535_p1 = scmp.lt.u32.totalorder %s531_s18, %s674_s0 }
   0x7   :  { %p537_p2 = pnand %p535_p1, %p532_p0 }
   0x9   :  { %540 = shalt.err (!%p537_p2)
}
   0xa   :  { %s541_s23 = scalar_lea.vmem %s18_s13, 512  ;;  %p546_p4 = scmp.lt.s32.totalorder %s18_s13, %s18_s13 }
   0xb   :  { %p542_p3 = scmp.ne.s32.totalorder %s18_s13, %s541_s23  ;;  %p547_p5 = scmp.lt.s32.totalorder %s541_s23, %s541_s23 }
   0xd   :  { %p548_p6 = por %p547_p5, %p546_p4 }
   0xf   :  { %p549_p7 = pnand %p548_p6, %p542_p3 }
  0x11   :  { %552 = shalt.err (!%p549_p7)
}
  0x12   :  { %20 = dma.hbm_to_vmem [thread:$0]  %s674_s0, 512, %s18_s13, [#allocation3]  }
  0x13   :  { %s553_s28 = scalar_lea.hbm %s675_s1, 4096 }
  0x14   :  { %p554_p8 = scmp.ne.s32.totalorder %s675_s1, %s553_s28  ;;  %p557_p9 = scmp.lt.u32.totalorder %s553_s28, %s675_s1 }
  0x16   :  { %p559_p10 = pnand %p557_p9, %p554_p8 }
  0x18   :  { %562 = shalt.err (!%p559_p10)
}
  0x19   :  { %s563_s6 = scalar_lea.vmem %s628_s15, 4096  ;;  %p568_p12 = scmp.lt.s32.totalorder %s628_s15, %s628_s15 }
  0x1a   :  { %p564_p11 = scmp.ne.s32.totalorder %s628_s15, %s563_s6  ;;  %p569_p13 = scmp.lt.s32.totalorder %s563_s6, %s563_s6 }
  0x1c   :  { %p570_p0 = por %p569_p13, %p568_p12 }
  0x1e   :  { %p571_p1 = pnand %p570_p0, %p564_p11 }
  0x20   :  { %574 = shalt.err (!%p571_p1)
}
  0x21   :  { %s605_s0 = smov 64   ;;  %s606_s7 = smov 4  }
  0x22   :  { %32 = dma.hbm_to_vmem [thread:$0]  %s675_s1, 4096, %s628_s15, [#allocation6], %s605_s0, %s605_s0, %s606_s7  }
  0x23   :  { %597 = dma.done.wait [#allocation3], 512  }
  0x24   :  { %598 = vsyncadd [#allocation3], 4294966784 }
  0x25   :  { %599 = dma.done.wait [#allocation6], 4096  }
  0x26   :  { %600 = vsyncadd [#allocation6], 4294963200  ;;  %v499_v0 = vld [vmem:[#allocation5 + $0x40] sm:$0xff]   ;;  %v503_v4 = vld [vmem:[#allocation5 + $0x48] sm:$0xff]   ;;  %s607_s11 = smov [#allocation7]  }
  0x27   :  { %v500_v1 = vld [vmem:[#allocation5 + $0xc0] sm:$0xff]   ;;  %450 = vmatprep.subr.bf16.mxu0 %v499_v0  ;;  %v504_v5 = vld [vmem:[#allocation5 + $0xc8] sm:$0xff]   ;;  %v507_v8 = vld [vmem:[#allocation5 + $0x50] sm:$0xff]   ;;  %s407_s12 = sshll.u32 %s607_s11, 4  ;;  %s408_s12 = int_to_ptr.vmem [resolvable:$true] %s407_s12 }
  0x28   :  { %v501_v2 = vld [vmem:[#allocation5] sm:$0xff]   ;;  %472 = vmatprep.subr.bf16.mxu1 %v500_v1  ;;  %v505_v6 = vld [vmem:[#allocation5 + $0x8] sm:$0xff]   ;;  %v508_v9 = vld [vmem:[#allocation5 + $0xd0] sm:$0xff]   ;;  %s575_s13 = scalar_lea.vmem %s408_s12, 128  ;;  %p580_p3 = scmp.lt.s32.totalorder %s408_s12, %s408_s12 }
  0x29   :  { %v502_v3 = vld [vmem:[#allocation5 + $0x80] sm:$0xff]   ;;  %451 = vmatpush3.bf16.msra.mxu0 %v501_v2  ;;  %v506_v7 = vld [vmem:[#allocation5 + $0x88] sm:$0xff]   ;;  %v509_v10 = vld [vmem:[#allocation5 + $0x10] sm:$0xff]   ;;  %p576_p2 = scmp.ne.s32.totalorder %s408_s12, %s575_s13  ;;  %p581_p4 = scmp.lt.s32.totalorder %s575_s13, %s575_s13 }
  0x2a   :  { %473 = vmatpush3.bf16.msra.mxu1 %v502_v3  ;;  %452 = vmatprep.subr.bf16.mxu0 %v503_v4  ;;  %v510_v11 = vld [vmem:[#allocation5 + $0x90] sm:$0xff]   ;;  %v511_v12 = vld [vmem:[#allocation5 + $0x58] sm:$0xff]   ;;  %v515_v16 = vld [vmem:[#allocation5 + $0x60] sm:$0xff]  }
  0x2b   :  { %474 = vmatprep.subr.bf16.mxu1 %v504_v5  ;;  %v512_v13 = vld [vmem:[#allocation5 + $0xd8] sm:$0xff]   ;;  %v516_v17 = vld [vmem:[#allocation5 + $0xe0] sm:$0xff]   ;;  %v519_v20 = vld [vmem:[#allocation5 + $0x68] sm:$0xff]   ;;  %p582_p5 = por %p581_p4, %p580_p3 }
  0x2c   :  { %v513_v14 = vld [vmem:[#allocation5 + $0x18] sm:$0xff]   ;;  %v517_v18 = vld [vmem:[#allocation5 + $0x20] sm:$0xff]   ;;  %v520_v21 = vld [vmem:[#allocation5 + $0xe8] sm:$0xff]  }
  0x2d   :  { %453 = vmatpush3.bf16.msra.mxu0 %v505_v6  ;;  %v514_v15 = vld [vmem:[#allocation5 + $0x98] sm:$0xff]   ;;  %v518_v19 = vld [vmem:[#allocation5 + $0xa0] sm:$0xff]   ;;  %v521_v22 = vld [vmem:[#allocation5 + $0x28] sm:$0xff]   ;;  %p583_p6 = pnand %p582_p5, %p576_p2 }
  0x2e   :  { %475 = vmatpush3.bf16.msra.mxu1 %v506_v7  ;;  %454 = vmatprep.subr.bf16.mxu0 %v507_v8  ;;  %v522_v23 = vld [vmem:[#allocation5 + $0xa8] sm:$0xff]   ;;  %v523_v24 = vld [vmem:[#allocation5 + $0x70] sm:$0xff]   ;;  %v527_v28 = vld [vmem:[#allocation5 + $0x78] sm:$0xff]  }
  0x2f   :  { %476 = vmatprep.subr.bf16.mxu1 %v508_v9  ;;  %v524_v25 = vld [vmem:[#allocation5 + $0xf0] sm:$0xff]   ;;  %v528_v29 = vld [vmem:[#allocation5 + $0xf8] sm:$0xff]   ;;  %v55_v32 = vld [vmem:[#allocation2 + $0x8] sm:$0xff] }
  0x30   :  { %v525_v26 = vld [vmem:[#allocation5 + $0x30] sm:$0xff]   ;;  %v529_v30 = vld [vmem:[#allocation5 + $0x38] sm:$0xff]   ;;  %v54_v34 = vld [vmem:[#allocation2] sm:$0xff]  ;;  %v59_v35 = vpack.c.bf16 %v55_v32, %v55_v32 }
  0x31   :  { %455 = vmatpush3.bf16.msra.mxu0 %v509_v10  ;;  %v526_v27 = vld [vmem:[#allocation5 + $0xb0] sm:$0xff]   ;;  %v530_v31 = vld [vmem:[#allocation5 + $0xb8] sm:$0xff]   ;;  %v58_v37 = vpack.c.bf16 %v54_v34, %v54_v34  ;;  %v417_v48 = vld [vmem:[%s676_s2] ss:$0 sm:$0xff] }
  0x32   :  { %477 = vmatpush3.bf16.msra.mxu1 %v510_v11  ;;  %456 = vmatprep.subr.bf16.mxu0 %v511_v12  ;;  %v57_v33 = vld [vmem:[#allocation2 + $0x18] sm:$0xff]  ;;  %v56_v38 = vld [vmem:[#allocation2 + $0x10] sm:$0xff] }
  0x33   :  { %478 = vmatprep.subr.bf16.mxu1 %v512_v13  ;;  %v61_v36 = vpack.c.bf16 %v57_v33, %v57_v33  ;;  %v60_v39 = vpack.c.bf16 %v56_v38, %v56_v38  ;;  %351 = vmatprep.mubr.bf16.mxu0 %v59_v35 }
  0x35   :  { %457 = vmatpush3.bf16.msra.mxu0 %v513_v14  ;;  %391 = vmatprep.mubr.bf16.mxu1 %v61_v36 }
  0x36   :  { %479 = vmatpush3.bf16.msra.mxu1 %v514_v15  ;;  %458 = vmatprep.subr.bf16.mxu0 %v515_v16 }
  0x37   :  { %480 = vmatprep.subr.bf16.mxu1 %v516_v17 }
  0x39   :  { %459 = vmatpush3.bf16.msra.mxu0 %v517_v18 }
  0x3a   :  { %481 = vmatpush3.bf16.msra.mxu1 %v518_v19  ;;  %460 = vmatprep.subr.bf16.mxu0 %v519_v20 }
  0x3b   :  { %482 = vmatprep.subr.bf16.mxu1 %v520_v21 }
  0x3d   :  { %461 = vmatpush3.bf16.msra.mxu0 %v521_v22 }
  0x3e   :  { %483 = vmatpush3.bf16.msra.mxu1 %v522_v23  ;;  %462 = vmatprep.subr.bf16.mxu0 %v523_v24 }
  0x3f   :  { %484 = vmatprep.subr.bf16.mxu1 %v524_v25 }
  0x41   :  { %463 = vmatpush3.bf16.msra.mxu0 %v525_v26 }
  0x42   :  { %485 = vmatpush3.bf16.msra.mxu1 %v526_v27  ;;  %464 = vmatprep.subr.bf16.mxu0 %v527_v28 }
  0x43   :  { %486 = vmatprep.subr.bf16.mxu1 %v528_v29 }
  0x45   :  { %465 = vmatpush3.bf16.msra.mxu0 %v529_v30 }
  0x46   :  { %487 = vmatpush3.bf16.msra.mxu1 %v530_v31 }
  0x48   :  { %352 = vmatmul.mubr.bf16.vlgmr.msra.gmra.mrb[0].mxu0 %v58_v37 }
  0x49   :  { %392 = vmatmul.mubr.bf16.vlgmr.msra.gmra.mrb[0].mxu1 %v60_v39 }
 0x11b   :  { %v466_v40 = vpop.f32.mrb[0].mxu0 }
 0x11c   :  { %v488_v41 = vpop.f32.mrb[0].mxu1  ;;  %v467_v42 = vpop.f32.mrb[1].mxu0 }
 0x11d   :  { %v489_v43 = vpop.f32.mrb[1].mxu1  ;;  %v468_v44 = vadd.f32 %v467_v42, %v466_v40  ;;  %v469_v46 = vpop.f32.mrb[2].mxu0 }
 0x11e   :  { %v490_v45 = vadd.f32 %v489_v43, %v488_v41  ;;  %v491_v47 = vpop.f32.mrb[2].mxu1  ;;  %v470_v49 = vpop.f32.mrb[3].mxu0 }
 0x11f   :  { %v492_v50 = vpop.f32.mrb[3].mxu1 }
 0x120   :  { %v394_v51 = vadd.f32 %v490_v45, %v468_v44 }
 0x122   :  { %v399_v52 = vadd.f32 %v417_v48, %v394_v51 }
 0x124   :  { %400 = vst [vmem:[#allocation7] sm:$0xff] %v399_v52 }
 0x125   :  { %586 = shalt.err (!%p583_p6)
}
 0x126   :  { %s587_s16 = scalar_lea.hbm %s677_s3, 128 }
 0x127   :  { %p588_p7 = scmp.ne.s32.totalorder %s677_s3, %s587_s16  ;;  %p591_p8 = scmp.lt.u32.totalorder %s587_s16, %s677_s3 }
 0x129   :  { %p593_p9 = pnand %p591_p8, %p588_p7 }
 0x12b   :  { %596 = shalt.err (!%p593_p9)
}
 0x12c   :  { %410 = dma.vmem_to_hbm [thread:$0]  %s408_s12, 128, %s677_s3, [#allocation4]  }
 0x12d   :  { %601 = dma.done.wait [#allocation4], 128  }
 0x12e   :  { %602 = vsyncadd [#allocation4], 4294967168 }
 0x12f   :  { %414 = vsyncpa [#allocation3], 1 }
 0x130   :  { %415 = vsyncpa [#allocation6], 1 }
 0x131   :  { %416 = vsyncpa [#allocation4], 1 }

</bundles_post_ra>
